<compile_context>
chip_gen: v7x
topology: tpu7x:2x2x1
jax: 0.10.0
libtpu: 0.0.40
codegen_flags: <defaults>
</compile_context>

<pallas_src>
import functools

import jax
import jax.numpy as jnp
from jax.experimental import pallas as pl
from jax.experimental.pallas import tpu as pltpu


def _gap_linear_kernel(x_ref, w_ref, b_ref, o_ref, acc_ref, *, inv_hw):
    # x_ref  : (b_tile, C, hw_tile) NCHW-native spatial tile (spatial on lanes)
    # w_ref  : (C, M) classifier weight (C on contraction axis), resident
    # b_ref  : (1, M) classifier bias, resident
    # o_ref  : (b_tile, M) f32 logits for this batch block
    # acc_ref: (b_tile, C) f32 running spatial sum (VMEM scratch)
    #
    # NOTE: correctness of the scratch accumulator relies on the reduction
    # (spatial) axis being the LAST grid axis and marked "arbitrary" -- it is
    # iterated sequentially, innermost, on one core. Do not reorder the grid.
    k = pl.program_id(1)

    @pl.when(k == 0)
    def _init():
        acc_ref[...] = jnp.zeros_like(acc_ref)

    # Spatial (lane-axis) reduction on the XLU; widens to f32 inside the sum
    # without materializing an f32 copy of the whole tile.
    acc_ref[...] += jnp.sum(x_ref[...], axis=-1, dtype=jnp.float32)

    @pl.when(k == pl.num_programs(1) - 1)
    def _finalize():
        pooled = acc_ref[...] * inv_hw                          # (b_tile, C) f32
        # Feed the MXU in the weight's dtype (bf16 weights stay bf16; no big
        # per-finalize f32 upcast of the weight), accumulate in f32.
        logits = jnp.dot(pooled.astype(w_ref.dtype), w_ref[...],
                         preferred_element_type=jnp.float32)    # (b_tile, M)
        o_ref[...] = logits + b_ref[...].astype(jnp.float32)


def _largest_divisor_at_most(n, cap):
    cap = int(max(1, min(n, cap)))
    for d in range(cap, 0, -1):
        if n % d == 0:
            return d
    return 1


def _vmem_budgets():
    """Generation-aware budgets: (target bytes per input block, vmem limit)."""
    try:
        vmem = int(pltpu.get_tpu_info().vmem_capacity_bytes)
    except Exception:
        vmem = 64 * 1024 * 1024  # conservative (v7x-sized) default
    # ~VMEM/16 per (double-buffered) input block, clamped to [2 MiB, 8 MiB]:
    #   v5e/v6e (128 MiB) -> 8 MiB blocks;  v7x (64 MiB) -> 4 MiB blocks.
    target_block = int(min(8 << 20, max(2 << 20, vmem // 16)))
    # Scoped-VMEM limit: v5e/v6e -> 64 MiB (safe on 128 MiB parts),
    # v7x -> 32 MiB (64 MiB physical).
    vmem_limit = int(min(64 << 20, max(32 << 20, vmem // 2)))
    return target_block, vmem_limit


def _pick_tiles(n, c, hw, itemsize, target_bytes, prefer_b=None):
    """Pick (b_tile, hw_tile): b_tile divides n, one input block stays near
    target_bytes, and hw_tile is the full extent or a 128-multiple dividing hw
    (lane-dim legality)."""
    if prefer_b is None:
        prefer_b = 16 if itemsize <= 2 else 8
    per_image = c * hw * itemsize
    if per_image <= target_bytes:
        b_cap = max(1, target_bytes // per_image)
        return _largest_divisor_at_most(n, min(prefer_b, b_cap)), hw
    # One image per block already exceeds the target: tile the spatial axis.
    row_bytes = c * itemsize
    budget = max(128, (target_bytes // row_bytes) // 128 * 128)
    t = budget
    while t >= 128:
        if hw % t == 0:
            return 1, int(t)
        t -= 128
    return 1, hw  # no 128-aligned divisor: full extent (correct, bigger DMA)


def image_classifier_matrix_head(feats, weight, bias, *, b_tile=None,
                                 hw_tile=None, vmem_limit_bytes=None):
    """GlobalAvgPool2d + Linear on extracted feature maps.

    feats : (N, C, H, W)   weight : (M, C)   bias : (M,)   ->  logits (N, M) f32
    """
    n, c, h, w = feats.shape
    hw = h * w
    m = weight.shape[0]

    # NCHW consumed natively: merging the trailing (H, W) dims is a pure
    # reshape (no data movement) -- no wrapper transpose pass over HBM.
    x3 = feats.reshape(n, c, hw)
    # Weight as (C, M) so the finalize matmul is a plain NN matmul. This is a
    # tiny one-off (M*C elements); in a real model the parameter would simply
    # be stored pre-transposed.
    w_t = jnp.transpose(weight, (1, 0))
    b2 = bias.reshape(1, m)

    target_block_bytes, vmem_default = _vmem_budgets()
    if vmem_limit_bytes is None:
        vmem_limit_bytes = vmem_default

    auto_b, auto_hw = _pick_tiles(n, c, hw, x3.dtype.itemsize,
                                  target_block_bytes)
    if b_tile is None or b_tile <= 0 or n % b_tile != 0:
        b_tile = auto_b
    if (hw_tile is None or hw % hw_tile != 0
            or (hw_tile != hw and hw_tile % 128 != 0)):
        hw_tile = auto_hw

    # Grid: batch blocks ("parallel") x spatial reduction ("arbitrary", LAST).
    grid = (n // b_tile, hw // hw_tile)
    kernel = functools.partial(_gap_linear_kernel, inv_hw=float(1.0 / hw))

    out_shape = jax.ShapeDtypeStruct((n, m), jnp.float32)
    out_spec = pl.BlockSpec((b_tile, m), lambda i, k: (i, 0))
    scratch = [pltpu.VMEM((b_tile, c), jnp.float32)]
    cparams = pltpu.CompilerParams(
        dimension_semantics=("parallel", "arbitrary"),
        vmem_limit_bytes=int(vmem_limit_bytes),
    )

    def _call(single_buffer_params):
        x_spec = pl.BlockSpec((b_tile, c, hw_tile), lambda i, k: (i, 0, k))
        if single_buffer_params:
            # Constant block index -> never re-fetched; one buffer is enough.
            w_spec = pl.BlockSpec((c, m), lambda i, k: (0, 0),
                                  pipeline_mode=pl.Buffered(1))
            b_spec = pl.BlockSpec((1, m), lambda i, k: (0, 0),
                                  pipeline_mode=pl.Buffered(1))
        else:
            w_spec = pl.BlockSpec((c, m), lambda i, k: (0, 0))
            b_spec = pl.BlockSpec((1, m), lambda i, k: (0, 0))
        return pl.pallas_call(
            kernel,
            out_shape=out_shape,
            grid=grid,
            in_specs=[x_spec, w_spec, b_spec],
            out_specs=out_spec,
            scratch_shapes=scratch,
            compiler_params=cparams,
        )(x3, w_t, b2)

    try:
        return _call(True)
    except Exception:
        # Fallback for jax versions that reject pl.Buffered(1) on pallas_call
        # operands: default double-buffering (same semantics, more VMEM).
        return _call(False)


if __name__ == "__main__":
    key = jax.random.PRNGKey(0)
    k1, k2, k3 = jax.random.split(key, 3)

    # Small shapes consistent with the module's forward
    # (backbone feature maps -> GlobalAvgPool2d -> Linear).
    N, C, H, W = 2, 4, 16, 16
    M = 3  # num_classes

    feats = jax.random.normal(k1, (N, C, H, W), dtype=jnp.float32)
    weight = jax.random.normal(k2, (M, C), dtype=jnp.float32) * 0.1
    bias = jax.random.normal(k3, (M,), dtype=jnp.float32) * 0.1

    # Auto-tiled path (single reduction step at this toy size) and an
    # explicitly tiled path that exercises the multi-step accumulator.
    logits_auto = image_classifier_matrix_head(feats, weight, bias)
    logits_tiled = image_classifier_matrix_head(feats, weight, bias,
                                                b_tile=1, hw_tile=128)
    jax.block_until_ready((logits_auto, logits_tiled))

    ref = jnp.mean(feats, axis=(2, 3)) @ weight.T + bias
    assert logits_auto.shape == (N, M), logits_auto.shape
    assert jnp.allclose(logits_auto, ref, atol=1e-5, rtol=1e-5), (
        float(jnp.max(jnp.abs(logits_auto - ref))))
    assert jnp.allclose(logits_tiled, ref, atol=1e-5, rtol=1e-5), (
        float(jnp.max(jnp.abs(logits_tiled - ref))))

    print("KERNEL_OK")
</pallas_src>

<mosaic_0001>
module attributes {stable_mosaic.version = 11 : i64} {
  func.func @_gap_linear_kernel(%arg0: i32, %arg1: i32, %arg2: memref<2x4x256xf32, #tpu.memory_space<vmem>>, %arg3: memref<4x3xf32, #tpu.memory_space<vmem>>, %arg4: memref<1x3xf32, #tpu.memory_space<vmem>>, %arg5: memref<2x3xf32, #tpu.memory_space<vmem>>, %arg6: memref<2x4xf32, #tpu.memory_space<vmem>>) attributes {dimension_semantics = [#tpu.dimension_semantics<parallel>, #tpu.dimension_semantics<arbitrary>], iteration_bounds = array<i64: 1, 1>, scalar_prefetch = 0 : i64, scratch_operands = 1 : i64, tpu.core_type = #tpu.core_type<tc>, window_params = [{transform_indices = @transform_0, window_bounds = array<i64: 2, 4, 256>}, {pipeline_mode = #tpu.pipeline_mode<synchronous>, transform_indices = @transform_1, window_bounds = array<i64: 4, 3>}, {pipeline_mode = #tpu.pipeline_mode<synchronous>, transform_indices = @transform_2, window_bounds = array<i64: 1, 3>}, {transform_indices = @transform_3, window_bounds = array<i64: 2, 3>}]} {
    %c0_i32 = arith.constant 0 : i32
    %0 = arith.cmpi eq, %arg1, %c0_i32 : i32
    %1 = arith.extui %0 : i1 to i32
    %c0_i32_0 = arith.constant 0 : i32
    %2 = arith.cmpi ne, %1, %c0_i32_0 : i32
    scf.if %2 {
      %cst_9 = arith.constant 0.000000e+00 : f32
      %11 = vector.broadcast %cst_9 : f32 to vector<2x4xf32>
      %c0_10 = arith.constant 0 : index
      %c0_11 = arith.constant 0 : index
      %12 = vector.load %arg6[%c0_10, %c0_11] : memref<2x4xf32, #tpu.memory_space<vmem>>, vector<2x4xf32>
      tpu.vector_store %arg6[%c0_10, %c0_11], %11 {strides = array<i32>} : memref<2x4xf32, #tpu.memory_space<vmem>>, vector<2x4xf32>,
    } else {
    }
    %c0 = arith.constant 0 : index
    %c0_1 = arith.constant 0 : index
    %3 = vector.load %arg6[%c0, %c0_1] : memref<2x4xf32, #tpu.memory_space<vmem>>, vector<2x4xf32>
    %c0_2 = arith.constant 0 : index
    %c0_3 = arith.constant 0 : index
    %c0_4 = arith.constant 0 : index
    %4 = vector.load %arg2[%c0_2, %c0_3, %c0_4] : memref<2x4x256xf32, #tpu.memory_space<vmem>>, vector<2x4x256xf32>
    %cst = arith.constant dense<0.000000e+00> : vector<2x4xf32>
    %5 = vector.multi_reduction <add>, %4, %cst [2] : vector<2x4x256xf32> to vector<2x4xf32>
    %6 = arith.addf %3, %5 : vector<2x4xf32>
    %c0_5 = arith.constant 0 : index
    %c0_6 = arith.constant 0 : index
    %7 = vector.load %arg6[%c0_5, %c0_6] : memref<2x4xf32, #tpu.memory_space<vmem>>, vector<2x4xf32>
    tpu.vector_store %arg6[%c0_5, %c0_6], %6 {strides = array<i32>} : memref<2x4xf32, #tpu.memory_space<vmem>>, vector<2x4xf32>,
    %c0_i32_7 = arith.constant 0 : i32
    %8 = arith.cmpi eq, %arg1, %c0_i32_7 : i32
    %9 = arith.extui %8 : i1 to i32
    %c0_i32_8 = arith.constant 0 : i32
    %10 = arith.cmpi ne, %9, %c0_i32_8 : i32
    scf.if %10 {
      %c0_9 = arith.constant 0 : index
      %c0_10 = arith.constant 0 : index
      %11 = vector.load %arg6[%c0_9, %c0_10] : memref<2x4xf32, #tpu.memory_space<vmem>>, vector<2x4xf32>
      %cst_11 = arith.constant 3.906250e-03 : f32
      %12 = vector.broadcast %cst_11 : f32 to vector<2x4xf32>
      %13 = arith.mulf %11, %12 : vector<2x4xf32>
      %c0_12 = arith.constant 0 : index
      %c0_13 = arith.constant 0 : index
      %14 = vector.load %arg3[%c0_12, %c0_13] : memref<4x3xf32, #tpu.memory_space<vmem>>, vector<4x3xf32>
      %cst_14 = arith.constant dense<0.000000e+00> : vector<2x3xf32>
      %15 = tpu.matmul %13, %14, %cst_14 {dimension_numbers = #tpu.dot_dimension_numbers<[1], [0], [0], [1], [0, 0, 1, 1], [], []>} : vector<2x4xf32>, vector<4x3xf32>, vector<2x3xf32> -> vector<2x3xf32>
      %c0_15 = arith.constant 0 : index
      %c0_16 = arith.constant 0 : index
      %16 = vector.load %arg4[%c0_15, %c0_16] : memref<1x3xf32, #tpu.memory_space<vmem>>, vector<1x3xf32>
      %17 = vector.broadcast %16 : vector<1x3xf32> to vector<2x3xf32>
      %18 = arith.addf %15, %17 : vector<2x3xf32>
      %c0_17 = arith.constant 0 : index
      %c0_18 = arith.constant 0 : index
      %19 = vector.load %arg5[%c0_17, %c0_18] : memref<2x3xf32, #tpu.memory_space<vmem>>, vector<2x3xf32>
      tpu.vector_store %arg5[%c0_17, %c0_18], %18 {strides = array<i32>} : memref<2x3xf32, #tpu.memory_space<vmem>>, vector<2x3xf32>,
    } else {
    }
    return
  }
  func.func @transform_0(%arg0: i32, %arg1: i32) -> (i32, i32, i32) {
    %c0_i32 = arith.constant 0 : i32
    %c0_i32_0 = arith.constant 0 : i32
    return %arg0, %c0_i32, %arg1 : i32, i32, i32
  }
  func.func @transform_1(%arg0: i32, %arg1: i32) -> (i32, i32) {
    %c0_i32 = arith.constant 0 : i32
    %c0_i32_0 = arith.constant 0 : i32
    %c0_i32_1 = arith.constant 0 : i32
    return %c0_i32, %c0_i32_0 : i32, i32
  }
  func.func @transform_2(%arg0: i32, %arg1: i32) -> (i32, i32) {
    %c0_i32 = arith.constant 0 : i32
    %c0_i32_0 = arith.constant 0 : i32
    %c0_i32_1 = arith.constant 0 : i32
    return %c0_i32, %c0_i32_0 : i32, i32
  }
  func.func @transform_3(%arg0: i32, %arg1: i32) -> (i32, i32) {
    %c0_i32 = arith.constant 0 : i32
    %c0_i32_0 = arith.constant 0 : i32
    return %arg0, %c0_i32 : i32, i32
  }
}

module attributes {stable_mosaic.version = 11 : i64} {
  func.func @_gap_linear_kernel(%arg0: i32, %arg1: i32, %arg2: memref<2x4x256xf32, #tpu.memory_space<vmem>>, %arg3: memref<4x3xf32, #tpu.memory_space<vmem>>, %arg4: memref<1x3xf32, #tpu.memory_space<vmem>>, %arg5: memref<2x3xf32, #tpu.memory_space<vmem>>, %arg6: memref<2x4xf32, #tpu.memory_space<vmem>>) attributes {dimension_semantics = [#tpu.dimension_semantics<parallel>, #tpu.dimension_semantics<arbitrary>], iteration_bounds = array<i64: 1, 1>, scalar_prefetch = 0 : i64, scratch_operands = 1 : i64, tpu.core_type = #tpu.core_type<tc>, window_params = [{transform_indices = @transform_0, window_bounds = array<i64: 2, 4, 256>}, {pipeline_mode = #tpu.pipeline_mode<synchronous>, transform_indices = @transform_1, window_bounds = array<i64: 4, 3>}, {pipeline_mode = #tpu.pipeline_mode<synchronous>, transform_indices = @transform_2, window_bounds = array<i64: 1, 3>}, {transform_indices = @transform_3, window_bounds = array<i64: 2, 3>}]} {
    %c0_i32 = arith.constant 0 : i32
    %0 = arith.cmpi eq, %arg1, %c0_i32 : i32
    %1 = arith.extui %0 : i1 to i32
    %c0_i32_0 = arith.constant 0 : i32
    %2 = arith.cmpi ne, %1, %c0_i32_0 : i32
    scf.if %2 {
      %cst_9 = arith.constant 0.000000e+00 : f32
      %11 = vector.broadcast %cst_9 : f32 to vector<2x4xf32>
      %c0_10 = arith.constant 0 : index
      %c0_11 = arith.constant 0 : index
      %12 = vector.load %arg6[%c0_10, %c0_11] : memref<2x4xf32, #tpu.memory_space<vmem>>, vector<2x4xf32>
      tpu.vector_store %arg6[%c0_10, %c0_11], %11 {strides = array<i32>} : memref<2x4xf32, #tpu.memory_space<vmem>>, vector<2x4xf32>,
    } else {
    }
    %c0 = arith.constant 0 : index
    %c0_1 = arith.constant 0 : index
    %3 = vector.load %arg6[%c0, %c0_1] : memref<2x4xf32, #tpu.memory_space<vmem>>, vector<2x4xf32>
    %c0_2 = arith.constant 0 : index
    %c0_3 = arith.constant 0 : index
    %c0_4 = arith.constant 0 : index
    %4 = vector.load %arg2[%c0_2, %c0_3, %c0_4] : memref<2x4x256xf32, #tpu.memory_space<vmem>>, vector<2x4x256xf32>
    %cst = arith.constant dense<0.000000e+00> : vector<2x4xf32>
    %5 = vector.multi_reduction <add>, %4, %cst [2] : vector<2x4x256xf32> to vector<2x4xf32>
    %6 = arith.addf %3, %5 : vector<2x4xf32>
    %c0_5 = arith.constant 0 : index
    %c0_6 = arith.constant 0 : index
    %7 = vector.load %arg6[%c0_5, %c0_6] : memref<2x4xf32, #tpu.memory_space<vmem>>, vector<2x4xf32>
    tpu.vector_store %arg6[%c0_5, %c0_6], %6 {strides = array<i32>} : memref<2x4xf32, #tpu.memory_space<vmem>>, vector<2x4xf32>,
    %c0_i32_7 = arith.constant 0 : i32
    %8 = arith.cmpi eq, %arg1, %c0_i32_7 : i32
    %9 = arith.extui %8 : i1 to i32
    %c0_i32_8 = arith.constant 0 : i32
    %10 = arith.cmpi ne, %9, %c0_i32_8 : i32
    scf.if %10 {
      %c0_9 = arith.constant 0 : index
      %c0_10 = arith.constant 0 : index
      %11 = vector.load %arg6[%c0_9, %c0_10] : memref<2x4xf32, #tpu.memory_space<vmem>>, vector<2x4xf32>
      %cst_11 = arith.constant 3.906250e-03 : f32
      %12 = vector.broadcast %cst_11 : f32 to vector<2x4xf32>
      %13 = arith.mulf %11, %12 : vector<2x4xf32>
      %c0_12 = arith.constant 0 : index
      %c0_13 = arith.constant 0 : index
      %14 = vector.load %arg3[%c0_12, %c0_13] : memref<4x3xf32, #tpu.memory_space<vmem>>, vector<4x3xf32>
      %cst_14 = arith.constant dense<0.000000e+00> : vector<2x3xf32>
      %15 = tpu.matmul %13, %14, %cst_14 {dimension_numbers = #tpu.dot_dimension_numbers<[1], [0], [0], [1], [0, 0, 1, 1], [], []>} : vector<2x4xf32>, vector<4x3xf32>, vector<2x3xf32> -> vector<2x3xf32>
      %c0_15 = arith.constant 0 : index
      %c0_16 = arith.constant 0 : index
      %16 = vector.load %arg4[%c0_15, %c0_16] : memref<1x3xf32, #tpu.memory_space<vmem>>, vector<1x3xf32>
      %17 = vector.broadcast %16 : vector<1x3xf32> to vector<2x3xf32>
      %18 = arith.addf %15, %17 : vector<2x3xf32>
      %c0_17 = arith.constant 0 : index
      %c0_18 = arith.constant 0 : index
      %19 = vector.load %arg5[%c0_17, %c0_18] : memref<2x3xf32, #tpu.memory_space<vmem>>, vector<2x3xf32>
      tpu.vector_store %arg5[%c0_17, %c0_18], %18 {strides = array<i32>} : memref<2x3xf32, #tpu.memory_space<vmem>>, vector<2x3xf32>,
    } else {
    }
    return
  }
  func.func @transform_0(%arg0: i32, %arg1: i32) -> (i32, i32, i32) {
    %c0_i32 = arith.constant 0 : i32
    %c0_i32_0 = arith.constant 0 : i32
    return %arg0, %c0_i32, %arg1 : i32, i32, i32
  }
  func.func @transform_1(%arg0: i32, %arg1: i32) -> (i32, i32) {
    %c0_i32 = arith.constant 0 : i32
    %c0_i32_0 = arith.constant 0 : i32
    %c0_i32_1 = arith.constant 0 : i32
    return %c0_i32, %c0_i32_0 : i32, i32
  }
  func.func @transform_2(%arg0: i32, %arg1: i32) -> (i32, i32) {
    %c0_i32 = arith.constant 0 : i32
    %c0_i32_0 = arith.constant 0 : i32
    %c0_i32_1 = arith.constant 0 : i32
    return %c0_i32, %c0_i32_0 : i32, i32
  }
  func.func @transform_3(%arg0: i32, %arg1: i32) -> (i32, i32) {
    %c0_i32 = arith.constant 0 : i32
    %c0_i32_0 = arith.constant 0 : i32
    return %arg0, %c0_i32 : i32, i32
  }
}

</mosaic_0001>

<bundles_post_ra>
// kernel: tpu_custom_call.1
= control target key start
LH: loop header
LB: loop body
LE: loop exit
PB: predicated region body
PF: predicated region fallthrough
CT: control target
= control target key end

     0   :  { %8 = vsyncpa [#allocation4], 0  ;;  %s357_s0 = inlined_call_operand.hbm [shape: f32[2,4,256], index: 0, kind: input, shape index: {}]   ;;  %s358_s1 = inlined_call_operand.hbm [shape: f32[4,3], index: 1, kind: input, shape index: {}]   ;;  %s359_s2 = inlined_call_operand.vmem [shape: f32[1,3], index: 2, kind: input, shape index: {}]   ;;  %s360_s3 = inlined_call_operand.hbm [shape: f32[2,3], index: 3, kind: output, shape index: {}]  }
   0x1   :  { %9 = vsyncpa [#allocation7], 0 }
   0x2   :  { %10 = vsyncpa [#allocation5], 0  ;;  %s284_s12 = smov [#allocation3]   ;;  %s212_s16 = scalar_lea.hbm %s357_s0, 256 }
   0x3   :  { %s16_s13 = sshll.u32 %s284_s12, 4  ;;  %p213_p0 = scmp.ne.s32.totalorder %s357_s0, %s212_s16  ;;  %s17_s13 = int_to_ptr.vmem [resolvable:$true] %s16_s13 }
   0x4   :  { %p216_p1 = scmp.lt.u32.totalorder %s212_s16, %s357_s0 }
   0x6   :  { %p218_p2 = pnand %p216_p1, %p213_p0 }
   0x8   :  { %221 = shalt.err (!%p218_p2)
}
   0x9   :  { %s222_s21 = scalar_lea.vmem %s17_s13, 256  ;;  %p227_p4 = scmp.lt.s32.totalorder %s17_s13, %s17_s13 }
   0xa   :  { %p223_p3 = scmp.ne.s32.totalorder %s17_s13, %s222_s21  ;;  %p228_p5 = scmp.lt.s32.totalorder %s222_s21, %s222_s21 }
   0xc   :  { %p229_p6 = por %p228_p5, %p227_p4 }
   0xe   :  { %p230_p7 = pnand %p229_p6, %p223_p3 }
  0x10   :  { %233 = shalt.err (!%p230_p7)
}
  0x11   :  { %s285_s22 = smov 128   ;;  %s286_s23 = smov 8  }
  0x12   :  { %22 = dma.hbm_to_vmem [thread:$0]  %s357_s0, 256, %s17_s13, [#allocation4], %s285_s22, %s285_s22, %s286_s23  }
  0x13   :  { %s287_s26 = smov [#allocation6]   ;;  %s234_s30 = scalar_lea.hbm %s358_s1, 64 }
  0x14   :  { %s29_s27 = sshll.u32 %s287_s26, 4  ;;  %p235_p8 = scmp.ne.s32.totalorder %s358_s1, %s234_s30  ;;  %s30_s27 = int_to_ptr.vmem [resolvable:$true] %s29_s27 }
  0x15   :  { %p238_p9 = scmp.lt.u32.totalorder %s234_s30, %s358_s1 }
  0x17   :  { %p240_p10 = pnand %p238_p9, %p235_p8 }
  0x19   :  { %243 = shalt.err (!%p240_p10)
}
  0x1a   :  { %s244_s8 = scalar_lea.vmem %s30_s27, 64  ;;  %p249_p12 = scmp.lt.s32.totalorder %s30_s27, %s30_s27 }
  0x1b   :  { %p245_p11 = scmp.ne.s32.totalorder %s30_s27, %s244_s8  ;;  %p250_p13 = scmp.lt.s32.totalorder %s244_s8, %s244_s8 }
  0x1d   :  { %p251_p0 = por %p250_p13, %p249_p12 }
  0x1f   :  { %p252_p1 = pnand %p251_p0, %p245_p11 }
  0x21   :  { %255 = shalt.err (!%p252_p1)
}
  0x22   :  { %32 = dma.hbm_to_vmem [thread:$0]  %s358_s1, 64, %s30_s27, [#allocation7]  }
  0x23   :  { %278 = dma.done.wait [#allocation4], 256  }
  0x24   :  { %279 = vsyncadd [#allocation4], 4294967040 }
  0x25   :  { %280 = dma.done.wait [#allocation7], 64  }
  0x26   :  { %281 = vsyncadd [#allocation7], 4294967232  ;;  %vm56_vm0 = vcmask 1043456   ;;  %v48_v0 = vld [vmem:[#allocation3] sm:$0xff]  ;;  %v49_v1 = vld [vmem:[#allocation3 + $0x8] sm:$0xff]  ;;  %vm45_vm1 = vcmask 25600   ;;  %v69_v12 = vlaneseq }
  0x27   :  { %v52_v2 = vcombine.high %v48_v0, %v48_v0  ;;  %v57_v3 = vsel %vm56_vm0, %v48_v0, 0.0  ;;  %v53_v4 = vcombine.high %v49_v1, %v49_v1  ;;  %v62_v6 = vsel %vm56_vm0, %v49_v1, 0.0  ;;  %v90_v11 = vld [vmem:[#allocation6] sm:$0xf]  ;;  %v193_v25 = vld [vmem:[%s359_s2] ss:$0 sm:$0xff] }
  0x28   :  { %v288_v10 = vmov 0.0   ;;  %vm289_vm2 = vmmov 0   ;;  %v70_v13 = vand.u32 127, %v69_v12  ;;  %v72_v14 = vshrl.u32 %v69_v12, 7  ;;  %s290_s11 = smov [#allocation8]  }
  0x29   :  { %v58_v5 = vsel %vm56_vm0, %v52_v2, 0.0  ;;  %v63_v7 = vsel %vm56_vm0, %v53_v4, 0.0  ;;  %46 = vst.msk [vmem:[#allocation2] sm:$0x3] %vm45_vm1, %v288_v10  ;;  %198 = vmatprep.subr.mxu0 %v288_v10  ;;  %200 = vmatprep.mubr.msk.f32.mxu0 %vm289_vm2, %v288_v10  ;;  %vm79_vm3 = vcmask 1041409   ;;  %vm98_vm4 = vcmask 31744  }
  0x2a   :  { %v59_v8 = vadd.f32 %v58_v5, %v57_v3  ;;  %v64_v9 = vadd.f32 %v63_v7, %v62_v6  ;;  %199 = vmatpush3.msk.msra.mxu0 %vm56_vm0, %v90_v11  ;;  %v73_v16 = vsub.s32 %v70_v13, %v72_v14  ;;  %s183_s12 = sshll.u32 %s290_s11, 4  ;;  %vm175_vm5 = vcmask 17408   ;;  %s184_s12 = int_to_ptr.vmem [resolvable:$true] %s183_s12 }
  0x2b   :  { %s256_s13 = scalar_lea.vmem %s184_s12, 32  ;;  %p261_p3 = scmp.lt.s32.totalorder %s184_s12, %s184_s12 }
  0x2c   :  { %60 = vadd.xlane.f32.xlu0 %v59_v8  ;;  %p257_p2 = scmp.ne.s32.totalorder %s184_s12, %s256_s13  ;;  %p262_p4 = scmp.lt.s32.totalorder %s256_s13, %s256_s13 }
  0x2e   :  { %p263_p5 = por %p262_p4, %p261_p3 }
  0x30   :  { %65 = vadd.xlane.f32.xlu0 %v64_v9  ;;  %v47_v20 = vld [vmem:[#allocation2] sm:$0x3]  ;;  %p264_p6 = pnand %p263_p5, %p257_p2 }
  0xb9   :  { %v61_v15 = vpop.xlane.xlu0 %60 }
  0xba   :  { %v74_v18 = vrot.slane %v61_v15, %v73_v16 }
  0xbd   :  { %v66_v17 = vpop.xlane.xlu0 %65 }
  0xbe   :  { %v78_v19 = vrot.slane %v66_v17, %v73_v16 }
  0xc0   :  { %v80_v21 = vsel %vm79_vm3, %v78_v19, %v74_v18 }
  0xc1   :  { %v82_v22 = vadd.f32 %v80_v21, %v47_v20 }
  0xc3   :  { %84 = vst.msk [vmem:[#allocation2] sm:$0x3] %vm45_vm1, %v82_v22 }
  0xca   :  { %v88_v23 = vld [vmem:[#allocation2] sm:$0x3] }
  0xcb   :  { %v89_v24 = vmul.f32 0.00390625, %v88_v23 }
  0xcd   :  { %201 = vmatmul.mubr.msk.f32.vlgmr.msra.gmra.mrb[0].mxu0 %vm98_vm4, %v89_v24 }
 0x1a0   :  { %v171_v26 = vpop.f32.mrb[0].mxu0 }
 0x1a1   :  { %v172_v27 = vadd.f32 %v193_v25, %v171_v26  ;;  %v202_v28 = vpop.f32.mrb[1].mxu0 }
 0x1a3   :  { %176 = vst.msk [vmem:[#allocation8] sm:$0x3] %vm175_vm5, %v172_v27 }
 0x1a4   :  { %267 = shalt.err (!%p264_p6)
}
 0x1a5   :  { %s268_s16 = scalar_lea.hbm %s360_s3, 32 }
 0x1a6   :  { %p269_p7 = scmp.ne.s32.totalorder %s360_s3, %s268_s16  ;;  %p272_p8 = scmp.lt.u32.totalorder %s268_s16, %s360_s3 }
 0x1a8   :  { %p274_p9 = pnand %p272_p8, %p269_p7 }
 0x1aa   :  { %277 = shalt.err (!%p274_p9)
}
 0x1ab   :  { %186 = dma.vmem_to_hbm [thread:$0]  %s184_s12, 32, %s360_s3, [#allocation5]  }
 0x1ac   :  { %282 = dma.done.wait [#allocation5], 32  }
 0x1ad   :  { %283 = vsyncadd [#allocation5], 4294967264 }
 0x1ae   :  { %190 = vsyncpa [#allocation4], 1 }
 0x1af   :  { %191 = vsyncpa [#allocation7], 1 }
 0x1b0   :  { %192 = vsyncpa [#allocation5], 1 }

// kernel: tpu_custom_call.1
= control target key start
LH: loop header
LB: loop body
LE: loop exit
PB: predicated region body
PF: predicated region fallthrough
CT: control target
= control target key end

     0   :  { %8 = vsyncpa [#allocation4], 0  ;;  %s357_s0 = inlined_call_operand.hbm [shape: f32[2,4,256], index: 0, kind: input, shape index: {}]   ;;  %s358_s1 = inlined_call_operand.hbm [shape: f32[4,3], index: 1, kind: input, shape index: {}]   ;;  %s359_s2 = inlined_call_operand.vmem [shape: f32[1,3], index: 2, kind: input, shape index: {}]   ;;  %s360_s3 = inlined_call_operand.hbm [shape: f32[2,3], index: 3, kind: output, shape index: {}]  }
   0x1   :  { %9 = vsyncpa [#allocation7], 0 }
   0x2   :  { %10 = vsyncpa [#allocation5], 0  ;;  %s284_s12 = smov [#allocation3]   ;;  %s212_s16 = scalar_lea.hbm %s357_s0, 256 }
   0x3   :  { %s16_s13 = sshll.u32 %s284_s12, 4  ;;  %p213_p0 = scmp.ne.s32.totalorder %s357_s0, %s212_s16  ;;  %s17_s13 = int_to_ptr.vmem [resolvable:$true] %s16_s13 }
   0x4   :  { %p216_p1 = scmp.lt.u32.totalorder %s212_s16, %s357_s0 }
   0x6   :  { %p218_p2 = pnand %p216_p1, %p213_p0 }
   0x8   :  { %221 = shalt.err (!%p218_p2)
}
   0x9   :  { %s222_s21 = scalar_lea.vmem %s17_s13, 256  ;;  %p227_p4 = scmp.lt.s32.totalorder %s17_s13, %s17_s13 }
   0xa   :  { %p223_p3 = scmp.ne.s32.totalorder %s17_s13, %s222_s21  ;;  %p228_p5 = scmp.lt.s32.totalorder %s222_s21, %s222_s21 }
   0xc   :  { %p229_p6 = por %p228_p5, %p227_p4 }
   0xe   :  { %p230_p7 = pnand %p229_p6, %p223_p3 }
  0x10   :  { %233 = shalt.err (!%p230_p7)
}
  0x11   :  { %s285_s22 = smov 128   ;;  %s286_s23 = smov 8  }
  0x12   :  { %22 = dma.hbm_to_vmem [thread:$0]  %s357_s0, 256, %s17_s13, [#allocation4], %s285_s22, %s285_s22, %s286_s23  }
  0x13   :  { %s287_s26 = smov [#allocation6]   ;;  %s234_s30 = scalar_lea.hbm %s358_s1, 64 }
  0x14   :  { %s29_s27 = sshll.u32 %s287_s26, 4  ;;  %p235_p8 = scmp.ne.s32.totalorder %s358_s1, %s234_s30  ;;  %s30_s27 = int_to_ptr.vmem [resolvable:$true] %s29_s27 }
  0x15   :  { %p238_p9 = scmp.lt.u32.totalorder %s234_s30, %s358_s1 }
  0x17   :  { %p240_p10 = pnand %p238_p9, %p235_p8 }
  0x19   :  { %243 = shalt.err (!%p240_p10)
}
  0x1a   :  { %s244_s8 = scalar_lea.vmem %s30_s27, 64  ;;  %p249_p12 = scmp.lt.s32.totalorder %s30_s27, %s30_s27 }
  0x1b   :  { %p245_p11 = scmp.ne.s32.totalorder %s30_s27, %s244_s8  ;;  %p250_p13 = scmp.lt.s32.totalorder %s244_s8, %s244_s8 }
  0x1d   :  { %p251_p0 = por %p250_p13, %p249_p12 }
  0x1f   :  { %p252_p1 = pnand %p251_p0, %p245_p11 }
  0x21   :  { %255 = shalt.err (!%p252_p1)
}
  0x22   :  { %32 = dma.hbm_to_vmem [thread:$0]  %s358_s1, 64, %s30_s27, [#allocation7]  }
  0x23   :  { %278 = dma.done.wait [#allocation4], 256  }
  0x24   :  { %279 = vsyncadd [#allocation4], 4294967040 }
  0x25   :  { %280 = dma.done.wait [#allocation7], 64  }
  0x26   :  { %281 = vsyncadd [#allocation7], 4294967232  ;;  %vm56_vm0 = vcmask 1043456   ;;  %v48_v0 = vld [vmem:[#allocation3] sm:$0xff]  ;;  %v49_v1 = vld [vmem:[#allocation3 + $0x8] sm:$0xff]  ;;  %vm45_vm1 = vcmask 25600   ;;  %v69_v12 = vlaneseq }
  0x27   :  { %v52_v2 = vcombine.high %v48_v0, %v48_v0  ;;  %v57_v3 = vsel %vm56_vm0, %v48_v0, 0.0  ;;  %v53_v4 = vcombine.high %v49_v1, %v49_v1  ;;  %v62_v6 = vsel %vm56_vm0, %v49_v1, 0.0  ;;  %v90_v11 = vld [vmem:[#allocation6] sm:$0xf]  ;;  %v193_v25 = vld [vmem:[%s359_s2] ss:$0 sm:$0xff] }
  0x28   :  { %v288_v10 = vmov 0.0   ;;  %vm289_vm2 = vmmov 0   ;;  %v70_v13 = vand.u32 127, %v69_v12  ;;  %v72_v14 = vshrl.u32 %v69_v12, 7  ;;  %s290_s11 = smov [#allocation8]  }
  0x29   :  { %v58_v5 = vsel %vm56_vm0, %v52_v2, 0.0  ;;  %v63_v7 = vsel %vm56_vm0, %v53_v4, 0.0  ;;  %46 = vst.msk [vmem:[#allocation2] sm:$0x3] %vm45_vm1, %v288_v10  ;;  %198 = vmatprep.subr.mxu0 %v288_v10  ;;  %200 = vmatprep.mubr.msk.f32.mxu0 %vm289_vm2, %v288_v10  ;;  %vm79_vm3 = vcmask 1041409   ;;  %vm98_vm4 = vcmask 31744  }
  0x2a   :  { %v59_v8 = vadd.f32 %v58_v5, %v57_v3  ;;  %v64_v9 = vadd.f32 %v63_v7, %v62_v6  ;;  %199 = vmatpush3.msk.msra.mxu0 %vm56_vm0, %v90_v11  ;;  %v73_v16 = vsub.s32 %v70_v13, %v72_v14  ;;  %s183_s12 = sshll.u32 %s290_s11, 4  ;;  %vm175_vm5 = vcmask 17408   ;;  %s184_s12 = int_to_ptr.vmem [resolvable:$true] %s183_s12 }
  0x2b   :  { %s256_s13 = scalar_lea.vmem %s184_s12, 32  ;;  %p261_p3 = scmp.lt.s32.totalorder %s184_s12, %s184_s12 }
  0x2c   :  { %60 = vadd.xlane.f32.xlu0 %v59_v8  ;;  %p257_p2 = scmp.ne.s32.totalorder %s184_s12, %s256_s13  ;;  %p262_p4 = scmp.lt.s32.totalorder %s256_s13, %s256_s13 }
  0x2e   :  { %p263_p5 = por %p262_p4, %p261_p3 }
  0x30   :  { %65 = vadd.xlane.f32.xlu0 %v64_v9  ;;  %v47_v20 = vld [vmem:[#allocation2] sm:$0x3]  ;;  %p264_p6 = pnand %p263_p5, %p257_p2 }
  0xb9   :  { %v61_v15 = vpop.xlane.xlu0 %60 }
  0xba   :  { %v74_v18 = vrot.slane %v61_v15, %v73_v16 }
  0xbd   :  { %v66_v17 = vpop.xlane.xlu0 %65 }
  0xbe   :  { %v78_v19 = vrot.slane %v66_v17, %v73_v16 }
  0xc0   :  { %v80_v21 = vsel %vm79_vm3, %v78_v19, %v74_v18 }
  0xc1   :  { %v82_v22 = vadd.f32 %v80_v21, %v47_v20 }
  0xc3   :  { %84 = vst.msk [vmem:[#allocation2] sm:$0x3] %vm45_vm1, %v82_v22 }
  0xca   :  { %v88_v23 = vld [vmem:[#allocation2] sm:$0x3] }
  0xcb   :  { %v89_v24 = vmul.f32 0.00390625, %v88_v23 }
  0xcd   :  { %201 = vmatmul.mubr.msk.f32.vlgmr.msra.gmra.mrb[0].mxu0 %vm98_vm4, %v89_v24 }
 0x1a0   :  { %v171_v26 = vpop.f32.mrb[0].mxu0 }
 0x1a1   :  { %v172_v27 = vadd.f32 %v193_v25, %v171_v26  ;;  %v202_v28 = vpop.f32.mrb[1].mxu0 }
 0x1a3   :  { %176 = vst.msk [vmem:[#allocation8] sm:$0x3] %vm175_vm5, %v172_v27 }
 0x1a4   :  { %267 = shalt.err (!%p264_p6)
}
 0x1a5   :  { %s268_s16 = scalar_lea.hbm %s360_s3, 32 }
 0x1a6   :  { %p269_p7 = scmp.ne.s32.totalorder %s360_s3, %s268_s16  ;;  %p272_p8 = scmp.lt.u32.totalorder %s268_s16, %s360_s3 }
 0x1a8   :  { %p274_p9 = pnand %p272_p8, %p269_p7 }
 0x1aa   :  { %277 = shalt.err (!%p274_p9)
}
 0x1ab   :  { %186 = dma.vmem_to_hbm [thread:$0]  %s184_s12, 32, %s360_s3, [#allocation5]  }
 0x1ac   :  { %282 = dma.done.wait [#allocation5], 32  }
 0x1ad   :  { %283 = vsyncadd [#allocation5], 4294967264 }
 0x1ae   :  { %190 = vsyncpa [#allocation4], 1 }
 0x1af   :  { %191 = vsyncpa [#allocation7], 1 }
 0x1b0   :  { %192 = vsyncpa [#allocation5], 1 }

</bundles_post_ra>
